<compile_context>
chip_gen: v6e
topology: v6e:2x2x1
jax: 0.10.0
libtpu: 0.0.40
codegen_flags: <defaults>
</compile_context>

<pallas_src>
import functools

import jax
import jax.numpy as jnp
from jax import lax
from jax.experimental import pallas as pl
from jax.experimental.pallas import tpu as pltpu


_NEG_BIG = -1e30  # finite "-inf" used to mask padded logit columns
_MIB = 1024 * 1024

# Tri-state cache: None = untried, True/False = pl.Buffered(1) accepted here.
_SINGLE_BUFFER_OK = None


def _round_up(n, m):
    return ((n + m - 1) // m) * m


def _cdiv(a, b):
    return -(-a // b)


def _vmem_capacity_bytes():
    """Physical VMEM per TensorCore; conservative 64 MiB if undiscoverable."""
    try:
        return int(pltpu.get_tpu_info().vmem_capacity_bytes)
    except Exception:
        return 64 * _MIB


def _cm_kernel_packed(x_ref, w1_ref, b1_ref, w2_ref, out_ref, *,
                      d, k, approx_recip):
    """Packed path: out cols [0,d)=tx, [d,d+k)=g, [d+k,d+2k)=g_pre, rest 0."""
    nt = (((1,), (1,)), ((), ()))  # contract dim-1 of lhs with dim-1 of rhs
    x = x_ref[...]

    # a = x @ W1^T + b1: real logits (1/T already folded) live in columns
    # [d+k, d+2k); every other column sits at ~-1e30, so softmax is exact.
    a = lax.dot_general(x, w1_ref[...], nt, preferred_element_type=jnp.float32)
    a = a + b1_ref[...]

    m = jnp.max(a, axis=-1, keepdims=True)
    e = jnp.exp(a - m)                         # filler columns -> exactly 0
    denom = jnp.sum(e, axis=-1, keepdims=True)
    g = e * pl.reciprocal(denom, approx=approx_recip)

    # s = g @ W2^T: cols [0,d) = tx, cols [d,d+k) = g (identity block), rest 0.
    s = lax.dot_general(g.astype(w2_ref.dtype), w2_ref[...], nt,
                        preferred_element_type=jnp.float32)

    # Drop the -1e30 filler and add g_pre back into its packed slot.
    col = lax.broadcasted_iota(jnp.int32, a.shape, 1)
    in_gpre = jnp.logical_and(col >= d + k, col < d + 2 * k)
    out_ref[...] = s + jnp.where(in_gpre, a, 0.0)


def _cm_kernel_unpacked(x_ref, wg_ref, bg_ref, wmu_ref,
                        gpre_ref, g_ref, tx_ref, *, approx_recip):
    """Classic 3-output path for large K / D (1/T pre-folded into wg/bg)."""
    nt = (((1,), (1,)), ((), ()))
    x = x_ref[...]

    g_pre = lax.dot_general(x, wg_ref[...], nt,
                            preferred_element_type=jnp.float32)
    g_pre = g_pre + bg_ref[...]
    gpre_ref[...] = g_pre

    m = jnp.max(g_pre, axis=-1, keepdims=True)
    e = jnp.exp(g_pre - m)                     # padded columns -> exactly 0
    denom = jnp.sum(e, axis=-1, keepdims=True)
    g = e * pl.reciprocal(denom, approx=approx_recip)
    g_ref[...] = g

    tx_ref[...] = lax.dot_general(g.astype(wmu_ref.dtype), wmu_ref[...], nt,
                                  preferred_element_type=jnp.float32)


def cm_forward(x, wg, bg, wmu, *, T=1.0, block_b=2048, use_bf16=True,
               approx_recip=None, pack_outputs=None):
    """Pallas implementation of cm.forward -> (x, g_pre, g, tx, u).

    Args:
      x:   (B, input_dim) float32
      wg:  (num_clusters, input_dim) float32    gamma_pre.weight
      bg:  (num_clusters,) float32              gamma_pre.bias
      wmu: (input_dim, num_clusters) float32    mu.weight
      use_bf16: cast matmul operands to bfloat16 (f32 accumulation/softmax).
    """
    B, D = x.shape
    K = wg.shape[0]
    assert wg.shape == (K, D) and wmu.shape == (D, K) and bg.shape == (K,)
    if approx_recip is None:
        approx_recip = use_bf16

    f32 = jnp.float32
    compute_dtype = jnp.bfloat16 if use_bf16 else f32
    in_item = jnp.dtype(compute_dtype).itemsize
    inv_T = float(1.0 / T)

    Dp = _round_up(D, 128)
    Kp = _round_up(K, 128)
    Wp = _round_up(D + 2 * K, 128)             # packed output width
    if pack_outputs is None:
        # Pack only when it cuts write bytes and stays narrow enough that the
        # widened softmax / second matmul remain cheap filler under the
        # memory bound.
        pack_outputs = (Wp < 2 * Kp + Dp) and (Wp <= 256)

    # ---- per-generation VMEM sizing (v7x: 64 MiB, v5e/v6e: 128 MiB) -------
    vmem_cap = _vmem_capacity_bytes()
    vmem_limit = max(32 * _MIB, (vmem_cap * 3) // 4)   # 48 MiB v7x, 96 MiB v6e
    budget = max(16 * _MIB, vmem_cap // 2)             # tile working-set budget

    if pack_outputs:
        weight_bytes = (Wp * Dp + Wp * Wp) * in_item + Wp * 4

        def _tile_bytes(b):
            # x tile + packed f32 out (double-buffered) + f32 intermediates.
            return 2 * (b * Dp * in_item + b * Wp * 4) + 2 * b * Wp * 4
    else:
        weight_bytes = (Kp * Dp + Dp * Kp) * in_item + Kp * 4

        def _tile_bytes(b):
            return (2 * (b * Dp * in_item + 2 * b * Kp * 4 + b * Dp * 4)
                    + 2 * b * Kp * 4)

    # ---- batch tile selection ----------------------------------------------
    bm_cap = max(8, min(_round_up(block_b, 8), _round_up(B, 8)))
    while bm_cap > 8 and weight_bytes + _tile_bytes(bm_cap) > budget:
        bm_cap = max(8, _round_up(bm_cap // 2, 8))
    # >=2 grid steps so both v7x TensorCores get work; balance tiles across the
    # grid to minimize dead batch-tail rows on this bandwidth-bound kernel.
    n_steps = max(_cdiv(B, bm_cap), 2)
    bm = max(8, _round_up(_cdiv(B, n_steps), 8))
    Bp = bm * n_steps
    grid = (n_steps,)

    # ---- wrapper-side padding / weight packing -----------------------------
    x_needs_copy = (Bp != B) or (Dp != D) or (x.dtype != jnp.dtype(compute_dtype))
    if x_needs_copy:
        x_p = jnp.zeros((Bp, Dp), compute_dtype).at[:B, :D].set(
            x.astype(compute_dtype))
    else:
        x_p = x  # aligned + same dtype: skip the extra HBM round trip

    if pack_outputs:
        # First operand: rows [D+K, D+2K) carry Wg/T, everything else 0.
        w1 = jnp.zeros((Wp, Dp), compute_dtype).at[D + K:D + 2 * K, :D].set(
            (wg * inv_T).astype(compute_dtype))
        # Bias: real columns carry bg/T; filler columns a finite (unscaled) -inf.
        b1 = jnp.full((1, Wp), _NEG_BIG, f32).at[0, D + K:D + 2 * K].set(
            (bg * inv_T).astype(f32))
        # Second operand (pre-transposed for the NT dot):
        #   out cols [0,D)   <- Wmu^T  (tx)
        #   out cols [D,D+K) <- I_K    (copies g into its packed slot)
        w2 = jnp.zeros((Wp, Wp), compute_dtype)
        w2 = w2.at[:D, D + K:D + 2 * K].set(wmu.astype(compute_dtype))
        w2 = w2.at[D:D + K, D + K:D + 2 * K].set(jnp.eye(K, dtype=compute_dtype))

        kernel = functools.partial(_cm_kernel_packed, d=D, k=K,
                                   approx_recip=bool(approx_recip))
        operands = (x_p, w1, b1, w2)
        weight_shapes = ((Wp, Dp), (1, Wp), (Wp, Wp))
        out_shape = jax.ShapeDtypeStruct((Bp, Wp), f32)
        out_specs = pl.BlockSpec((bm, Wp), lambda i: (i, 0))
    else:
        wg_aligned = (Kp == K and Dp == D and T == 1.0
                      and wg.dtype == jnp.dtype(compute_dtype))
        wg_p = wg if wg_aligned else (
            jnp.zeros((Kp, Dp), compute_dtype).at[:K, :D].set(
                (wg * inv_T).astype(compute_dtype)))
        wmu_aligned = (Dp == D and Kp == K
                       and wmu.dtype == jnp.dtype(compute_dtype))
        wmu_p = wmu if wmu_aligned else (
            jnp.zeros((Dp, Kp), compute_dtype).at[:D, :K].set(
                wmu.astype(compute_dtype)))
        bg_p = jnp.full((1, Kp), _NEG_BIG, f32).at[0, :K].set(
            (bg * inv_T).astype(f32))

        kernel = functools.partial(_cm_kernel_unpacked,
                                   approx_recip=bool(approx_recip))
        operands = (x_p, wg_p, bg_p, wmu_p)
        weight_shapes = ((Kp, Dp), (1, Kp), (Dp, Kp))
        out_shape = (jax.ShapeDtypeStruct((Bp, Kp), f32),
                     jax.ShapeDtypeStruct((Bp, Kp), f32),
                     jax.ShapeDtypeStruct((Bp, Dp), f32))
        out_specs = (pl.BlockSpec((bm, Kp), lambda i: (i, 0)),
                     pl.BlockSpec((bm, Kp), lambda i: (i, 0)),
                     pl.BlockSpec((bm, Dp), lambda i: (i, 0)))

    # ---- build and run the pallas_call -------------------------------------
    def _run(single_buffer_weights):
        def w_spec(shape):
            if single_buffer_weights:
                # Constant index map -> fetched once; no double buffer needed.
                return pl.BlockSpec(shape, lambda i: (0,) * len(shape),
                                    pipeline_mode=pl.Buffered(1))
            return pl.BlockSpec(shape, lambda i: (0,) * len(shape))

        in_specs = [pl.BlockSpec((bm, Dp), lambda i: (i, 0))]
        in_specs += [w_spec(s) for s in weight_shapes]

        call = pl.pallas_call(
            kernel,
            out_shape=out_shape,
            grid_spec=pltpu.PrefetchScalarGridSpec(
                num_scalar_prefetch=0,
                grid=grid,
                in_specs=in_specs,
                out_specs=out_specs,
            ),
            compiler_params=pltpu.CompilerParams(
                dimension_semantics=("parallel",),
                vmem_limit_bytes=int(vmem_limit),
            ),
        )
        outs = call(*operands)
        jax.block_until_ready(outs)
        return outs

    global _SINGLE_BUFFER_OK
    want_single = hasattr(pl, "Buffered") and _SINGLE_BUFFER_OK is not False
    if want_single:
        try:
            outs = _run(True)
            _SINGLE_BUFFER_OK = True
        except Exception:
            # TODO(synk): this JAX build rejects pipeline_mode=pl.Buffered(1)
            # on top-level BlockSpecs; fall back to default double buffering.
            _SINGLE_BUFFER_OK = False
            outs = _run(False)
    else:
        outs = _run(False)

    # ---- unpack / un-pad ----------------------------------------------------
    if pack_outputs:
        packed = outs
        tx = packed[:B, 0:D]
        g = packed[:B, D:D + K]
        g_pre = packed[:B, D + K:D + 2 * K]
    else:
        g_pre_p, g_p, tx_p = outs
        g_pre = g_pre_p[:B, :K]
        g = g_p[:B, :K]
        tx = tx_p[:B, :D]

    u = wmu.T  # (K, D) -- pure layout glue, no compute
    return (x, g_pre, g, tx, u)


def _reference(x, wg, bg, wmu, T=1.0):
    hp = jax.lax.Precision.HIGHEST
    g_pre = (jnp.dot(x, wg.T, precision=hp) + bg) / T
    g = jax.nn.softmax(g_pre, axis=-1)
    tx = jnp.dot(g, wmu.T, precision=hp)
    return (x, g_pre, g, tx, wmu.T)


if __name__ == "__main__":
    key = jax.random.PRNGKey(0)
    kx, kwg, kbg, kwmu, kx2, kwg2, kbg2, kwmu2 = jax.random.split(key, 8)

    # Small shapes consistent with the module: batch=8, input_dim=32, clusters=16.
    B, D, K = 8, 32, 16
    x = jax.random.normal(kx, (B, D), dtype=jnp.float32)
    # The PyTorch module inits mu.weight to zeros -- use random values so the
    # tx path exercises real compute.
    wg = jax.random.normal(kwg, (K, D), dtype=jnp.float32) * 0.1
    bg = jax.random.normal(kbg, (K,), dtype=jnp.float32) * 0.1
    wmu = jax.random.normal(kwmu, (D, K), dtype=jnp.float32) * 0.1

    def check(outs, refs, atol, rtol, tag):
        for name, o, r in zip(("x", "g_pre", "g", "tx", "u"), outs, refs):
            assert o.shape == r.shape, (tag, name, o.shape, r.shape)
            assert jnp.allclose(o, r, atol=atol, rtol=rtol), (tag, name)

    # 1) f32 packed-output path (exact reciprocal) -- strict tolerance.
    refs = _reference(x, wg, bg, wmu, T=1.0)
    outs = jax.block_until_ready(
        cm_forward(x, wg, bg, wmu, T=1.0, use_bf16=False))
    check(outs, refs, 1e-5, 1e-5, "f32-packed")

    # 2) Ragged batch + T != 1 (1/T folded into the weights in the wrapper).
    xr = jax.random.normal(kx2, (13, D), dtype=jnp.float32)
    refs_r = _reference(xr, wg, bg, wmu, T=0.7)
    outs_r = jax.block_until_ready(
        cm_forward(xr, wg, bg, wmu, T=0.7, use_bf16=False))
    check(outs_r, refs_r, 1e-5, 1e-5, "f32-ragged")

    # 3) Default fast path: bf16 operands + approx reciprocal -- relaxed tol.
    outs_bf = jax.block_until_ready(cm_forward(x, wg, bg, wmu, T=1.0))
    check(outs_bf, refs, 3e-2, 3e-2, "bf16-packed")

    # 4) Larger K/D takes the classic 3-output path (no packing), f32.
    B2, D2, K2 = 64, 256, 192
    x2 = jax.random.normal(kx2, (B2, D2), dtype=jnp.float32)
    wg2 = jax.random.normal(kwg2, (K2, D2), dtype=jnp.float32) * 0.05
    bg2 = jax.random.normal(kbg2, (K2,), dtype=jnp.float32) * 0.05
    wmu2 = jax.random.normal(kwmu2, (D2, K2), dtype=jnp.float32) * 0.05
    refs2 = _reference(x2, wg2, bg2, wmu2, T=1.0)
    outs2 = jax.block_until_ready(
        cm_forward(x2, wg2, bg2, wmu2, T=1.0, use_bf16=False))
    check(outs2, refs2, 5e-4, 5e-4, "f32-unpacked")

    print("KERNEL_OK")
</pallas_src>

<mosaic_0001>
module attributes {stable_mosaic.version = 11 : i64} {
  func.func @_cm_kernel_packed(%arg0: i32, %arg1: memref<8x128xf32, #tpu.memory_space<vmem>>, %arg2: memref<128x128xf32, #tpu.memory_space<vmem>>, %arg3: memref<1x128xf32, #tpu.memory_space<vmem>>, %arg4: memref<128x128xf32, #tpu.memory_space<vmem>>, %arg5: memref<8x128xf32, #tpu.memory_space<vmem>>) attributes {dimension_semantics = [#tpu.dimension_semantics<parallel>], iteration_bounds = array<i64: 2>, scalar_prefetch = 0 : i64, scratch_operands = 0 : i64, tpu.core_type = #tpu.core_type<tc>, window_params = [{transform_indices = @transform_0, window_bounds = array<i64: 8, 128>}, {pipeline_mode = #tpu.pipeline_mode<synchronous>, transform_indices = @transform_1, window_bounds = array<i64: 128, 128>}, {pipeline_mode = #tpu.pipeline_mode<synchronous>, transform_indices = @transform_2, window_bounds = array<i64: 1, 128>}, {pipeline_mode = #tpu.pipeline_mode<synchronous>, transform_indices = @transform_3, window_bounds = array<i64: 128, 128>}, {transform_indices = @transform_4, window_bounds = array<i64: 8, 128>}]} {
    %c0 = arith.constant 0 : index
    %c0_0 = arith.constant 0 : index
    %0 = vector.load %arg1[%c0, %c0_0] : memref<8x128xf32, #tpu.memory_space<vmem>>, vector<8x128xf32>
    %c0_1 = arith.constant 0 : index
    %c0_2 = arith.constant 0 : index
    %1 = vector.load %arg2[%c0_1, %c0_2] : memref<128x128xf32, #tpu.memory_space<vmem>>, vector<128x128xf32>
    %cst = arith.constant dense<0.000000e+00> : vector<8x128xf32>
    %2 = tpu.matmul %0, %1, %cst {dimension_numbers = #tpu.dot_dimension_numbers<[1], [1], [0], [0], [0, 0, 1, 0], [], []>} : vector<8x128xf32>, vector<128x128xf32>, vector<8x128xf32> -> vector<8x128xf32>
    %c0_3 = arith.constant 0 : index
    %c0_4 = arith.constant 0 : index
    %3 = vector.load %arg3[%c0_3, %c0_4] : memref<1x128xf32, #tpu.memory_space<vmem>>, vector<1x128xf32>
    %4 = vector.broadcast %3 : vector<1x128xf32> to vector<8x128xf32>
    %5 = arith.addf %2, %4 : vector<8x128xf32>
    %cst_5 = arith.constant dense<0xFF800000> : vector<8xf32>
    %6 = vector.multi_reduction <maximumf>, %5, %cst_5 [1] : vector<8x128xf32> to vector<8xf32>
    %7 = vector.shape_cast %6 : vector<8xf32> to vector<8x1xf32>
    %8 = vector.broadcast %7 : vector<8x1xf32> to vector<8x128xf32>
    %9 = arith.subf %5, %8 : vector<8x128xf32>
    %10 = math.exp %9 : vector<8x128xf32>
    %cst_6 = arith.constant dense<0.000000e+00> : vector<8xf32>
    %11 = vector.multi_reduction <add>, %10, %cst_6 [1] : vector<8x128xf32> to vector<8xf32>
    %12 = vector.shape_cast %11 : vector<8xf32> to vector<8x1xf32>
    %13 = tpu.reciprocal %12 : vector<8x1xf32> -> vector<8x1xf32>
    %14 = vector.broadcast %13 : vector<8x1xf32> to vector<8x128xf32>
    %15 = arith.mulf %10, %14 : vector<8x128xf32>
    %c0_7 = arith.constant 0 : index
    %c0_8 = arith.constant 0 : index
    %16 = vector.load %arg4[%c0_7, %c0_8] : memref<128x128xf32, #tpu.memory_space<vmem>>, vector<128x128xf32>
    %cst_9 = arith.constant dense<0.000000e+00> : vector<8x128xf32>
    %17 = tpu.matmul %15, %16, %cst_9 {dimension_numbers = #tpu.dot_dimension_numbers<[1], [1], [0], [0], [0, 0, 1, 0], [], []>} : vector<8x128xf32>, vector<128x128xf32>, vector<8x128xf32> -> vector<8x128xf32>
    %18 = tpu.iota {dimensions = array<i32: 1>} : vector<8x128xi32>
    %c48_i32 = arith.constant 48 : i32
    %19 = vector.broadcast %c48_i32 : i32 to vector<8x128xi32>
    %20 = arith.cmpi sge, %18, %19 : vector<8x128xi32>
    %c64_i32 = arith.constant 64 : i32
    %21 = vector.broadcast %c64_i32 : i32 to vector<8x128xi32>
    %22 = arith.cmpi slt, %18, %21 : vector<8x128xi32>
    %23 = arith.andi %20, %22 : vector<8x128xi1>
    %cst_10 = arith.constant 0.000000e+00 : f32
    %24 = vector.broadcast %cst_10 : f32 to vector<8x128xf32>
    %25 = arith.select %23, %5, %24 : vector<8x128xi1>, vector<8x128xf32>
    %26 = arith.addf %17, %25 : vector<8x128xf32>
    %c0_11 = arith.constant 0 : index
    %c0_12 = arith.constant 0 : index
    %27 = vector.load %arg5[%c0_11, %c0_12] : memref<8x128xf32, #tpu.memory_space<vmem>>, vector<8x128xf32>
    tpu.vector_store %arg5[%c0_11, %c0_12], %26 {strides = array<i32>} : memref<8x128xf32, #tpu.memory_space<vmem>>, vector<8x128xf32>,
    return
  }
  func.func @transform_0(%arg0: i32) -> (i32, i32) {
    %c0_i32 = arith.constant 0 : i32
    %c0_i32_0 = arith.constant 0 : i32
    return %arg0, %c0_i32 : i32, i32
  }
  func.func @transform_1(%arg0: i32) -> (i32, i32) {
    %c0_i32 = arith.constant 0 : i32
    %c0_i32_0 = arith.constant 0 : i32
    %c0_i32_1 = arith.constant 0 : i32
    return %c0_i32, %c0_i32_0 : i32, i32
  }
  func.func @transform_2(%arg0: i32) -> (i32, i32) {
    %c0_i32 = arith.constant 0 : i32
    %c0_i32_0 = arith.constant 0 : i32
    %c0_i32_1 = arith.constant 0 : i32
    return %c0_i32, %c0_i32_0 : i32, i32
  }
  func.func @transform_3(%arg0: i32) -> (i32, i32) {
    %c0_i32 = arith.constant 0 : i32
    %c0_i32_0 = arith.constant 0 : i32
    %c0_i32_1 = arith.constant 0 : i32
    return %c0_i32, %c0_i32_0 : i32, i32
  }
  func.func @transform_4(%arg0: i32) -> (i32, i32) {
    %c0_i32 = arith.constant 0 : i32
    %c0_i32_0 = arith.constant 0 : i32
    return %arg0, %c0_i32 : i32, i32
  }
}

module attributes {stable_mosaic.version = 11 : i64} {
  func.func @_cm_kernel_packed(%arg0: i32, %arg1: memref<8x128xf32, #tpu.memory_space<vmem>>, %arg2: memref<128x128xf32, #tpu.memory_space<vmem>>, %arg3: memref<1x128xf32, #tpu.memory_space<vmem>>, %arg4: memref<128x128xf32, #tpu.memory_space<vmem>>, %arg5: memref<8x128xf32, #tpu.memory_space<vmem>>) attributes {dimension_semantics = [#tpu.dimension_semantics<parallel>], iteration_bounds = array<i64: 2>, scalar_prefetch = 0 : i64, scratch_operands = 0 : i64, tpu.core_type = #tpu.core_type<tc>, window_params = [{transform_indices = @transform_0, window_bounds = array<i64: 8, 128>}, {pipeline_mode = #tpu.pipeline_mode<synchronous>, transform_indices = @transform_1, window_bounds = array<i64: 128, 128>}, {pipeline_mode = #tpu.pipeline_mode<synchronous>, transform_indices = @transform_2, window_bounds = array<i64: 1, 128>}, {pipeline_mode = #tpu.pipeline_mode<synchronous>, transform_indices = @transform_3, window_bounds = array<i64: 128, 128>}, {transform_indices = @transform_4, window_bounds = array<i64: 8, 128>}]} {
    %c0 = arith.constant 0 : index
    %c0_0 = arith.constant 0 : index
    %0 = vector.load %arg1[%c0, %c0_0] : memref<8x128xf32, #tpu.memory_space<vmem>>, vector<8x128xf32>
    %c0_1 = arith.constant 0 : index
    %c0_2 = arith.constant 0 : index
    %1 = vector.load %arg2[%c0_1, %c0_2] : memref<128x128xf32, #tpu.memory_space<vmem>>, vector<128x128xf32>
    %cst = arith.constant dense<0.000000e+00> : vector<8x128xf32>
    %2 = tpu.matmul %0, %1, %cst {dimension_numbers = #tpu.dot_dimension_numbers<[1], [1], [0], [0], [0, 0, 1, 0], [], []>} : vector<8x128xf32>, vector<128x128xf32>, vector<8x128xf32> -> vector<8x128xf32>
    %c0_3 = arith.constant 0 : index
    %c0_4 = arith.constant 0 : index
    %3 = vector.load %arg3[%c0_3, %c0_4] : memref<1x128xf32, #tpu.memory_space<vmem>>, vector<1x128xf32>
    %4 = vector.broadcast %3 : vector<1x128xf32> to vector<8x128xf32>
    %5 = arith.addf %2, %4 : vector<8x128xf32>
    %cst_5 = arith.constant dense<0xFF800000> : vector<8xf32>
    %6 = vector.multi_reduction <maximumf>, %5, %cst_5 [1] : vector<8x128xf32> to vector<8xf32>
    %7 = vector.shape_cast %6 : vector<8xf32> to vector<8x1xf32>
    %8 = vector.broadcast %7 : vector<8x1xf32> to vector<8x128xf32>
    %9 = arith.subf %5, %8 : vector<8x128xf32>
    %10 = math.exp %9 : vector<8x128xf32>
    %cst_6 = arith.constant dense<0.000000e+00> : vector<8xf32>
    %11 = vector.multi_reduction <add>, %10, %cst_6 [1] : vector<8x128xf32> to vector<8xf32>
    %12 = vector.shape_cast %11 : vector<8xf32> to vector<8x1xf32>
    %13 = tpu.reciprocal %12 : vector<8x1xf32> -> vector<8x1xf32>
    %14 = vector.broadcast %13 : vector<8x1xf32> to vector<8x128xf32>
    %15 = arith.mulf %10, %14 : vector<8x128xf32>
    %c0_7 = arith.constant 0 : index
    %c0_8 = arith.constant 0 : index
    %16 = vector.load %arg4[%c0_7, %c0_8] : memref<128x128xf32, #tpu.memory_space<vmem>>, vector<128x128xf32>
    %cst_9 = arith.constant dense<0.000000e+00> : vector<8x128xf32>
    %17 = tpu.matmul %15, %16, %cst_9 {dimension_numbers = #tpu.dot_dimension_numbers<[1], [1], [0], [0], [0, 0, 1, 0], [], []>} : vector<8x128xf32>, vector<128x128xf32>, vector<8x128xf32> -> vector<8x128xf32>
    %18 = tpu.iota {dimensions = array<i32: 1>} : vector<8x128xi32>
    %c48_i32 = arith.constant 48 : i32
    %19 = vector.broadcast %c48_i32 : i32 to vector<8x128xi32>
    %20 = arith.cmpi sge, %18, %19 : vector<8x128xi32>
    %c64_i32 = arith.constant 64 : i32
    %21 = vector.broadcast %c64_i32 : i32 to vector<8x128xi32>
    %22 = arith.cmpi slt, %18, %21 : vector<8x128xi32>
    %23 = arith.andi %20, %22 : vector<8x128xi1>
    %cst_10 = arith.constant 0.000000e+00 : f32
    %24 = vector.broadcast %cst_10 : f32 to vector<8x128xf32>
    %25 = arith.select %23, %5, %24 : vector<8x128xi1>, vector<8x128xf32>
    %26 = arith.addf %17, %25 : vector<8x128xf32>
    %c0_11 = arith.constant 0 : index
    %c0_12 = arith.constant 0 : index
    %27 = vector.load %arg5[%c0_11, %c0_12] : memref<8x128xf32, #tpu.memory_space<vmem>>, vector<8x128xf32>
    tpu.vector_store %arg5[%c0_11, %c0_12], %26 {strides = array<i32>} : memref<8x128xf32, #tpu.memory_space<vmem>>, vector<8x128xf32>,
    return
  }
  func.func @transform_0(%arg0: i32) -> (i32, i32) {
    %c0_i32 = arith.constant 0 : i32
    %c0_i32_0 = arith.constant 0 : i32
    return %arg0, %c0_i32 : i32, i32
  }
  func.func @transform_1(%arg0: i32) -> (i32, i32) {
    %c0_i32 = arith.constant 0 : i32
    %c0_i32_0 = arith.constant 0 : i32
    %c0_i32_1 = arith.constant 0 : i32
    return %c0_i32, %c0_i32_0 : i32, i32
  }
  func.func @transform_2(%arg0: i32) -> (i32, i32) {
    %c0_i32 = arith.constant 0 : i32
    %c0_i32_0 = arith.constant 0 : i32
    %c0_i32_1 = arith.constant 0 : i32
    return %c0_i32, %c0_i32_0 : i32, i32
  }
  func.func @transform_3(%arg0: i32) -> (i32, i32) {
    %c0_i32 = arith.constant 0 : i32
    %c0_i32_0 = arith.constant 0 : i32
    %c0_i32_1 = arith.constant 0 : i32
    return %c0_i32, %c0_i32_0 : i32, i32
  }
  func.func @transform_4(%arg0: i32) -> (i32, i32) {
    %c0_i32 = arith.constant 0 : i32
    %c0_i32_0 = arith.constant 0 : i32
    return %arg0, %c0_i32 : i32, i32
  }
}

</mosaic_0001>

<bundles_post_ra>
// kernel: tpu_custom_call.1
= control target key start
LH: loop header
LB: loop body
LE: loop exit
PB: predicated region body
PF: predicated region fallthrough
CT: control target
= control target key end

     0   :  { %9 = vsyncpa [#allocation3], 0  ;;  %s1140_s0 = inlined_call_operand.hbm [shape: f32[16,128], index: 0, kind: input, shape index: {}]   ;;  %s1141_s1 = inlined_call_operand.hbm [shape: f32[128,128], index: 1, kind: input, shape index: {}]   ;;  %s1142_s2 = inlined_call_operand.vmem [shape: f32[1,128], index: 2, kind: input, shape index: {}]   ;;  %s1143_s3 = inlined_call_operand.hbm [shape: f32[128,128], index: 3, kind: input, shape index: {}]   ;;  %s1144_s4 = inlined_call_operand.hbm [shape: f32[16,128], index: 4, kind: output, shape index: {}]  }
   0x1   :  { %11 = vsyncpa [#allocation3 + $0x1], 0 }
   0x2   :  { %12 = vsyncpa [#allocation6], 0 }
   0x3   :  { %13 = vsyncpa [#allocation4], 0 }
   0x4   :  { %15 = vsyncpa [#allocation4 + $0x1], 0  ;;  %s920_s15 = smov 0   ;;  %s922_s16 = smov 0  }
   0x5   :  { %s924_s17 = smov 0   ;;  %s926_s18 = smov 0  }
   0x6 LB: > { %s941_s19 = sadd.s32 4294967295, %s885_s18   ;;  %s541_s20 = sadd.s32 4294967294, %s885_s18   ;;  %s885_s18 = sphi %s926_s18, %s1166_s18   ;;  %s881_s17 = sphi %s924_s17, %s1165_s17   ;;  %s877_s16 = sphi %s922_s16, %s1164_s16   ;;  %s873_s15 = sphi %s920_s15, %s1163_s15  }
   0x7   : > { %p41_p0 = scmp.ne.s32.totalorder %s877_s16, %s873_s15  ;;  %p1145_p1 = scmp.eq.s32.totalorder %s941_s19, 0 }
   0x8   : > { %p134_p3 = scmp.eq.s32.totalorder %s541_s20, 1  ;;  %p542_p5 = scmp.ge.s32.totalorder %s885_s18, 1 }
   0x9   : > { %p950_p4 = por %p1145_p1, %p41_p0  ;;  %p141_p7 = scmp.lt.s32.totalorder %s885_s18, 3 }
   0xa   : > { %p955_p6 = por %p134_p3, %p41_p0  ;;  %s887_s24 = smov [#allocation5]  }
   0xb   : > { %s1149_s21 = scalar_select %p950_p4, 1, 0 }
   0xc   : > { %s1150_s22 = scalar_select %p955_p6, 1, 0 }
   0xd   : > { %p960_p8 = pnand %p542_p5, %p141_p7  ;;  %s153_s25 = sshll.u32 %s887_s24, 4  ;;  %s154_s25 = int_to_ptr.vmem [resolvable:$true] %s153_s25 }
   0xe   : > { %s888_s27 = smov [#allocation7]   ;;  %s748_s29 = scalar_lea.vmem %s154_s25, 2048 }
   0xf   : > { %s1151_s23 = scalar_select %p960_p8, 1, 0 }
  0x10   : > { %p674_p9 = pneg %p960_p8  ;;  %s169_s28 = sshll.u32 %s888_s27, 4  ;;  %s170_s28 = int_to_ptr.vmem [resolvable:$true] %s169_s28 }
  0x11   : > { %p749_p13 = scmp.ne.s32.totalorder %s154_s25, %s748_s29  ;;  %p756_p5 = scmp.lt.s32.totalorder %s154_s25, %s154_s25 }
  0x12   : > { %p969_p11 = pnand %p674_p9, %p1145_p1  ;;  %p757_p7 = scmp.lt.s32.totalorder %s748_s29, %s748_s29 }
  0x14   : > { %p739_p12 = pneg %p969_p11  ;;  %p758_p10 = por %p757_p7, %p756_p5 }
  0x16   : > { %p751_p0 = pnand %p749_p13, %p739_p12 }
  0x18   : > { %p752_p3 = pneg %p751_p0 }
  0x1a   : > { %p759_p9 = pnand %p758_p10, %p752_p3 }
  0x1c   : > { %762 = shalt.err (!%p759_p9)
}
  0x1d   : > { %s889_s30 = smov 128   ;;  %s890_s5 = smov 8  }
  0x1e   : > { %677 = dma.hbm_to_vmem [thread:$0]  (!%p969_p11), %s1141_s1, 2048, %s154_s25, [#allocation6], %s889_s30, %s889_s30, %s890_s5  }
  0x1f   : > { %s774_s8 = scalar_lea.vmem %s170_s28, 2048  ;;  %p782_p2 = scmp.lt.s32.totalorder %s170_s28, %s170_s28 }
  0x20   : > { %p775_p1 = scmp.ne.s32.totalorder %s170_s28, %s774_s8  ;;  %p783_p6 = scmp.lt.s32.totalorder %s774_s8, %s774_s8 }
  0x22   : > { %p777_p13 = pnand %p775_p1, %p739_p12  ;;  %p784_p5 = por %p783_p6, %p782_p2 }
  0x24   : > { %p778_p0 = pneg %p777_p13 }
  0x26   : > { %p785_p10 = pnand %p784_p5, %p778_p0 }
  0x28   : > { %788 = shalt.err (!%p785_p10)
}
  0x29   : > { %680 = dma.hbm_to_vmem [thread:$0]  (!%p969_p11), %s1143_s3, 2048, %s170_s28, [#allocation6], %s889_s30, %s889_s30, %s890_s5  }
  0x2a   : > { %s992_s11 = sadd.s32 1, %s885_s18   ;;  %s28_s12 = sadd.s32 1, %s881_s17 }
  0x2b   : > { %s25_s13 = ssub.s32 %s885_s18, %s992_s11  ;;  %p35_p1 = scmp.ne.s32.totalorder %s881_s17, %s877_s16 }
  0x2c   : > { %p26_p2 = scmp.eq.s32.totalorder %s25_s13, 0  ;;  %p36_p6 = scmp.eq.s32.totalorder %s885_s18, 0 }
  0x2d   : > { %p1153_p12 = scmp.eq.s32.totalorder %s941_s19, 1  ;;  %p691_p7 = scmp.lt.s32.totalorder %s885_s18, 2 }
  0x2e   : > { %s1008_s20 = scalar_select %p26_p2, %s881_s17, %s28_s12  }
  0x2f   : > { %p1002_p3 = por %p1153_p12, %p35_p1  ;;  %p37_p9 = por %p36_p6, %p35_p1 }
  0x30   : > { %s183_s24 = sand.u32 1, %s881_s17   ;;  %s547_s26 = sshll.u32 %s885_s18, 7 }
  0x31   : > { %s1154_s14 = scalar_select %p1002_p3, 1, 0 }
  0x32   : > { %s546_s25 = sshll.u32 %s183_s24, 3  ;;  %s1015_s29 = scalar_lea.hbm %s1140_s0, %s547_s26 }
  0x33   : > { %s187_s30 = scalar_lea.vmem [#allocation2], %s546_s25  ;;  %p1017_p11 = pnand %p691_p7, %p37_p9 }
  0x34   : > { %s194_s5 = sshll.u32 %s187_s30, 4  ;;  %s184_s7 = scalar_lea.sflag [#allocation3], %s183_s24  ;;  %s195_s5 = int_to_ptr.vmem [resolvable:$true] %s194_s5 }
  0x35   : > { %s789_s8 = scalar_lea.hbm %s1015_s29, 128  ;;  %p791_p0 = pneg %p1017_p11 }
  0x36   : > { %p790_p13 = scmp.ne.s32.totalorder %s1015_s29, %s789_s8  ;;  %s794_s12 = scalar_lea.hbm %s1140_s0, 256 }
  0x37   : > { %p795_p1 = scmp.lt.s32.totalorder %s1015_s29, %s1140_s0  ;;  %p796_p2 = scmp.lt.s32.totalorder %s794_s12, %s789_s8 }
  0x38   : > { %p792_p5 = pnand %p791_p0, %p790_p13 }
  0x39   : > { %p797_p6 = por %p796_p2, %p795_p1 }
  0x3a   : > { %p793_p10 = pneg %p792_p5 }
  0x3c   : > { %p798_p12 = pnand %p797_p6, %p793_p10 }
  0x3e   : > { %801 = shalt.err (!%p798_p12)
}
  0x3f   : > { %s802_s26 = scalar_lea.vmem %s195_s5, 128  ;;  %s891_s24 = smov [#allocation2]  }
  0x40   : > { %p803_p7 = scmp.ne.s32.totalorder %s195_s5, %s802_s26  ;;  %s807_s27 = sshll.u32 %s891_s24, 4  ;;  %s808_s27 = int_to_ptr.vmem [resolvable:$false] %s807_s27 }
  0x41   : > { %s809_s28 = scalar_lea.vmem %s808_s27, 256  ;;  %p810_p13 = scmp.lt.s32.totalorder %s195_s5, %s808_s27 }
  0x42   : > { %p805_p9 = pnand %p803_p7, %p791_p0  ;;  %p811_p5 = scmp.lt.s32.totalorder %s809_s28, %s802_s26 }
  0x44   : > { %p806_p3 = pneg %p805_p9  ;;  %p812_p4 = por %p811_p5, %p810_p13 }
  0x46   : > { %p813_p8 = pnand %p812_p4, %p806_p3 }
  0x48   : > { %816 = shalt.err (!%p813_p8)
}
  0x49   : > { %684 = dma.hbm_to_vmem [thread:$0]  (!%p1017_p11), %s1015_s29, 128, %s195_s5, %s184_s7  }
  0x4a   : > { %p1156_p10 = scmp.ne.s32.totalorder %s1151_s23, 0 }
  0x4b   : > { %s1038_s30 = sand.u32 (!%p1156_p10), 1, %s877_s16   ;;  %p1157_p4 = scmp.ne.s32.totalorder (!%p1156_p10), %s1149_s21, 0 }
  0x4c   : > { %203 = sbr.rel (%p1156_p10) target bundleno = 864 (0x360), region = 36  ;;  %s549_s8 = sshll.u32 (!%p1156_p10), %s1038_s30, 3 }
  0x4d   : > { %s206_s9 = scalar_lea.sflag (!%p1156_p10), [#allocation3], %s1038_s30  ;;  %s1044_s10 = scalar_lea.vmem (!%p1156_p10), [#allocation2], %s549_s8 }
  0x51   : > { %860 = dma.done.wait (%p1157_p4), %s206_s9, 128  }
  0x52   : > { %862 = vsyncadd (%p1157_p4), %s206_s9, 4294967168  ;;  %p1158_p8 = scmp.eq.s32.totalorder %s941_s19, 0 }
  0x54   : > { %864 = dma.done.wait (%p1158_p8), [#allocation6], 4096   ;;  %p1159_p3 = pmov %p1158_p8 }
  0x55   : > { %v892_v0 = vmov 0.0   ;;  %vm893_vm0 = vmmov 0   ;;  %v258_v1 = vld [vmem:[#allocation5 + $0x78] sm:$0xff]  ;;  %v257_v2 = vld [vmem:[#allocation5 + $0x70] sm:$0xff]  ;;  %v256_v3 = vld [vmem:[#allocation5 + $0x68] sm:$0xff]  ;;  %v361_v45 = vlaneseq  ;;  %s555_s29 = sshll.u32 %s941_s19, 7 }
  0x56   : > { %866 = vsyncadd (%p1159_p3), [#allocation6], 4294963200  ;;  %592 = vmatprep.subr.mxu0 %v892_v0  ;;  %624 = vmatprep.mubr.msk.f32.mxu0 %vm893_vm0, %v892_v0  ;;  %v255_v4 = vld [vmem:[#allocation5 + $0x60] sm:$0xff]  ;;  %v254_v5 = vld [vmem:[#allocation5 + $0x58] sm:$0xff]  ;;  %s241_s5 = scalar_lea.vmem [#allocation8], %s549_s8  ;;  %s1103_s13 = scalar_lea.hbm %s1144_s4, %s555_s29 }
  0x57   : > { %627 = vmatprep.subr.mxu1 %v892_v0  ;;  %659 = vmatprep.mubr.msk.f32.mxu1 %vm893_vm0, %v892_v0  ;;  %v253_v6 = vld [vmem:[#allocation5 + $0x50] sm:$0xff]  ;;  %v252_v7 = vld [vmem:[#allocation5 + $0x48] sm:$0xff]  ;;  %v251_v8 = vld [vmem:[#allocation5 + $0x40] sm:$0xff]  ;;  %v362_v46 = vand.u32 127, %v361_v45  ;;  %s452_s6 = sshll.u32 %s241_s5, 4  ;;  %s439_s25 = scalar_lea.sflag [#allocation4], %s1038_s30  ;;  %s453_s6 = int_to_ptr.vmem [resolvable:$true] %s452_s6 }
  0x58   : > { %593 = vmatpush3.xpose.msra.mxu0 %v258_v1  ;;  %v250_v9 = vld [vmem:[#allocation5 + $0x38] sm:$0xff]  ;;  %v249_v10 = vld [vmem:[#allocation5 + $0x30] sm:$0xff]  ;;  %v248_v11 = vld [vmem:[#allocation5 + $0x28] sm:$0xff]  ;;  %s817_s26 = scalar_lea.vmem %s453_s6, 128  ;;  %p1160_p0 = scmp.ne.s32.totalorder %s1154_s14, 0 }
  0x59   : > { %594 = vmatprep.subr.mxu0 %v892_v0  ;;  %v247_v12 = vld [vmem:[#allocation5 + $0x20] sm:$0xff]  ;;  %v246_v13 = vld [vmem:[#allocation5 + $0x18] sm:$0xff]  ;;  %v245_v14 = vld [vmem:[#allocation5 + $0x10] sm:$0xff]  ;;  %vm363_vm1 = vcmp.ge.s32.totalorder %v362_v46, 48  ;;  %vm364_vm2 = vcmp.lt.s32.totalorder %v362_v46, 64  ;;  %p818_p11 = scmp.ne.s32.totalorder %s453_s6, %s817_s26  ;;  %s894_s19 = smov [#allocation8]  }
  0x5a   : > { %v244_v15 = vld [vmem:[#allocation5 + $0x8] sm:$0xff]  ;;  %v243_v16 = vld [vmem:[#allocation5] sm:$0xff]  ;;  %v242_v17 = vld [vmem:[%s1044_s10] sm:$0xff]  ;;  %s821_s24 = sshll.u32 %s894_s19, 4  ;;  %s822_s24 = int_to_ptr.vmem [resolvable:$false] %s821_s24 }
  0x5b   : > { %v553_v18 = vld [vmem:[%s1142_s2] ss:$0 sm:$0xff]  ;;  %v360_v22 = vld [vmem:[#allocation7 + $0x78] sm:$0xff]  ;;  %v358_v24 = vld [vmem:[#allocation7 + $0x68] sm:$0xff]  ;;  %p819_p1 = pnand %p818_p11, %p1160_p0  ;;  %s823_s27 = scalar_lea.vmem %s822_s24, 256 }
  0x5c   : > { %595 = vmatpush3.xpose.msra.mxu0 %v257_v2  ;;  %628 = vmatpush3.xpose.msra.mxu1 %v360_v22  ;;  %v359_v23 = vld [vmem:[#allocation7 + $0x70] sm:$0xff]  ;;  %v357_v25 = vld [vmem:[#allocation7 + $0x60] sm:$0xff]  ;;  %v356_v26 = vld [vmem:[#allocation7 + $0x58] sm:$0xff]  ;;  %p824_p6 = scmp.lt.s32.totalorder %s453_s6, %s822_s24  ;;  %p825_p12 = scmp.lt.s32.totalorder %s823_s27, %s817_s26 }
  0x5d   : > { %596 = vmatprep.subr.mxu0 %v892_v0  ;;  %629 = vmatprep.subr.mxu1 %v892_v0  ;;  %v355_v27 = vld [vmem:[#allocation7 + $0x50] sm:$0xff]  ;;  %v354_v28 = vld [vmem:[#allocation7 + $0x48] sm:$0xff]  ;;  %v353_v29 = vld [vmem:[#allocation7 + $0x40] sm:$0xff]  ;;  %p820_p2 = pneg %p819_p1 }
  0x5e   : > { %v352_v30 = vld [vmem:[#allocation7 + $0x38] sm:$0xff]  ;;  %v351_v31 = vld [vmem:[#allocation7 + $0x30] sm:$0xff]  ;;  %v350_v32 = vld [vmem:[#allocation7 + $0x28] sm:$0xff]  ;;  %p826_p7 = por %p825_p12, %p824_p6 }
  0x5f   : > { %v349_v33 = vld [vmem:[#allocation7 + $0x20] sm:$0xff]  ;;  %v348_v38 = vld [vmem:[#allocation7 + $0x18] sm:$0xff]  ;;  %v347_v39 = vld [vmem:[#allocation7 + $0x10] sm:$0xff] }
  0x60   : > { %597 = vmatpush3.xpose.msra.mxu0 %v256_v3  ;;  %630 = vmatpush3.xpose.msra.mxu1 %v359_v23  ;;  %v346_v40 = vld [vmem:[#allocation7 + $0x8] sm:$0xff]  ;;  %v345_v41 = vld [vmem:[#allocation7] sm:$0xff]  ;;  %vm365_vm3 = vmand %vm363_vm1, %vm364_vm2  ;;  %p827_p9 = pnand %p826_p7, %p820_p2 }
  0x61   : > { %598 = vmatprep.subr.mxu0 %v892_v0  ;;  %631 = vmatprep.subr.mxu1 %v892_v0 }
  0x64   : > { %599 = vmatpush3.xpose.msra.mxu0 %v255_v4  ;;  %632 = vmatpush3.xpose.msra.mxu1 %v358_v24 }
  0x65   : > { %600 = vmatprep.subr.mxu0 %v892_v0  ;;  %633 = vmatprep.subr.mxu1 %v892_v0 }
  0x68   : > { %601 = vmatpush3.xpose.msra.mxu0 %v254_v5  ;;  %634 = vmatpush3.xpose.msra.mxu1 %v357_v25 }
  0x69   : > { %602 = vmatprep.subr.mxu0 %v892_v0  ;;  %635 = vmatprep.subr.mxu1 %v892_v0 }
  0x6c   : > { %603 = vmatpush3.xpose.msra.mxu0 %v253_v6  ;;  %636 = vmatpush3.xpose.msra.mxu1 %v356_v26 }
  0x6d   : > { %604 = vmatprep.subr.mxu0 %v892_v0  ;;  %637 = vmatprep.subr.mxu1 %v892_v0 }
  0x70   : > { %605 = vmatpush3.xpose.msra.mxu0 %v252_v7  ;;  %638 = vmatpush3.xpose.msra.mxu1 %v355_v27 }
  0x71   : > { %606 = vmatprep.subr.mxu0 %v892_v0  ;;  %639 = vmatprep.subr.mxu1 %v892_v0 }
  0x74   : > { %607 = vmatpush3.xpose.msra.mxu0 %v251_v8  ;;  %640 = vmatpush3.xpose.msra.mxu1 %v354_v28 }
  0x75   : > { %608 = vmatprep.subr.mxu0 %v892_v0  ;;  %641 = vmatprep.subr.mxu1 %v892_v0 }
  0x78   : > { %609 = vmatpush3.xpose.msra.mxu0 %v250_v9  ;;  %642 = vmatpush3.xpose.msra.mxu1 %v353_v29 }
  0x79   : > { %610 = vmatprep.subr.mxu0 %v892_v0  ;;  %643 = vmatprep.subr.mxu1 %v892_v0 }
  0x7c   : > { %611 = vmatpush3.xpose.msra.mxu0 %v249_v10  ;;  %644 = vmatpush3.xpose.msra.mxu1 %v352_v30 }
  0x7d   : > { %612 = vmatprep.subr.mxu0 %v892_v0  ;;  %645 = vmatprep.subr.mxu1 %v892_v0 }
  0x80   : > { %613 = vmatpush3.xpose.msra.mxu0 %v248_v11  ;;  %646 = vmatpush3.xpose.msra.mxu1 %v351_v31 }
  0x81   : > { %614 = vmatprep.subr.mxu0 %v892_v0  ;;  %647 = vmatprep.subr.mxu1 %v892_v0 }
  0x84   : > { %615 = vmatpush3.xpose.msra.mxu0 %v247_v12  ;;  %648 = vmatpush3.xpose.msra.mxu1 %v350_v32 }
  0x85   : > { %616 = vmatprep.subr.mxu0 %v892_v0  ;;  %649 = vmatprep.subr.mxu1 %v892_v0 }
  0x88   : > { %617 = vmatpush3.xpose.msra.mxu0 %v246_v13  ;;  %650 = vmatpush3.xpose.msra.mxu1 %v349_v33 }
  0x89   : > { %618 = vmatprep.subr.mxu0 %v892_v0  ;;  %651 = vmatprep.subr.mxu1 %v892_v0 }
  0x8c   : > { %619 = vmatpush3.xpose.msra.mxu0 %v245_v14  ;;  %652 = vmatpush3.xpose.msra.mxu1 %v348_v38 }
  0x8d   : > { %620 = vmatprep.subr.mxu0 %v892_v0  ;;  %653 = vmatprep.subr.mxu1 %v892_v0 }
  0x90   : > { %621 = vmatpush3.xpose.msra.mxu0 %v244_v15  ;;  %654 = vmatpush3.xpose.msra.mxu1 %v347_v39 }
  0x91   : > { %622 = vmatprep.subr.mxu0 %v892_v0  ;;  %655 = vmatprep.subr.mxu1 %v892_v0 }
  0x94   : > { %623 = vmatpush3.xpose.msra.mxu0 %v243_v16  ;;  %656 = vmatpush3.xpose.msra.mxu1 %v346_v40 }
  0x95   : > { %657 = vmatprep.subr.mxu1 %v892_v0 }
  0x97   : > { %625 = vmatmul.mubr.f32.vlgmr.msra.gmra.mxu0 %v242_v17 }
  0x98   : > { %658 = vmatpush3.xpose.msra.mxu1 %v345_v41 }
 0x157   : > { %v332_v19 = vpop.f32.mrf.mxu0 }
 0x158   : > { %v1077_v20 = vadd.f32 %v553_v18, %v332_v19 }
 0x159   : > { %v626_v21 = vpop.f32.mrf.mxu0 }
 0x15a   : > { %336 = vmax.xlane.f32.xlu0 %v1077_v20  ;;  %v366_v47 = vsel %vm365_vm3, %v1077_v20, 0.0 }
 0x1e3   : > { %v337_v34 = vpop.xlane.xlu0 %336 }
 0x1e4   : > { %v338_v35 = vsub.f32 %v1077_v20, %v337_v34 }
 0x1e6   : > { %v339_v36 = vmul.f32 1.442695, %v338_v35 }
 0x1e8   : > { %733 = vpow2.f32 %v339_v36 }
 0x1f5   : > { %v734_v37 = vpop.eup %733 }
 0x1f6   : > { %341 = vadd.xlane.f32.xlu0 %v734_v37 }
 0x27f   : > { %v342_v42 = vpop.xlane.xlu0 %341 }
 0x280   : > { %735 = vrcp.f32 %v342_v42 }
 0x28d   : > { %v736_v43 = vpop.eup %735 }
 0x28e   : > { %v344_v44 = vmul.f32 %v736_v43, %v734_v37 }
 0x290   : > { %660 = vmatmul.mubr.f32.vlgmr.msra.gmra.mxu1 %v344_v44 }
 0x350   : > { %v433_v48 = vpop.f32.mrf.mxu1 }
 0x351   : > { %v434_v49 = vadd.f32 %v433_v48, %v366_v47 }
 0x352   : > { %v661_v50 = vpop.f32.mrf.mxu1 }
 0x353   : > { %437 = vst [vmem:[%s241_s5] sm:$0xff] %v434_v49 }
 0x354   : > { %830 = shalt.err (!%p827_p9)
}
 0x355   : > { %s831_s28 = scalar_lea.hbm %s1103_s13, 128  ;;  %s835_s9 = scalar_lea.hbm %s1144_s4, 256 }
 0x356   : > { %p832_p13 = scmp.ne.s32.totalorder %s1103_s13, %s831_s28  ;;  %p836_p4 = scmp.lt.s32.totalorder %s1103_s13, %s1144_s4 }
 0x357   : > { %p837_p8 = scmp.lt.s32.totalorder %s835_s9, %s831_s28 }
 0x358   : > { %p833_p5 = pnand %p832_p13, %p1160_p0 }
 0x359   : > { %p838_p3 = por %p837_p8, %p836_p4 }
 0x35a   : > { %p834_p10 = pneg %p833_p5 }
 0x35c   : > { %p839_p11 = pnand %p838_p3, %p834_p10 }
 0x35e   : > { %842 = shalt.err (!%p839_p11)
}
 0x35f   : > { %672 = dma.vmem_to_hbm [thread:$0]  (%p1160_p0), %s453_s6, 128, %s1103_s13, %s439_s25  }
 0x360 PF: > { %s464_s23 = sand.u32 1, %s873_s15   ;;  %p1161_p1 = scmp.ne.s32.totalorder %s1150_s22, 0 }
 0x361   : > { %p1162_p2 = scmp.ge.s32.totalorder %s885_s18, 2  ;;  %s465_s29 = scalar_lea.sflag [#allocation4], %s464_s23 }
 0x363   : > { %p686_p6 = pnand %p1162_p2, %p1161_p1 }
 0x365   : > { %p687_p12 = pneg %p686_p6 }
 0x367   : > { %868 = dma.done.wait (%p687_p12), %s465_s29, 128  }
 0x368   : > { %870 = vsyncadd (%p687_p12), %s465_s29, 4294967168  ;;  %p18_p7 = scmp.ge.s32.totalorder %s992_s11, 4   ;;  %s1163_s15 = smov %s877_s16 }
 0x369   : > { %s1164_s16 = smov %s881_s17  ;;  %s1165_s17 = smov %s1008_s20 }
 0x36a   : > { %s1166_s18 = smov %s992_s11  ;;  %20 = sbr.rel (!%p18_p7) target bundleno = 6 (0x6), region = 89 }
 0x36f   :  { %470 = vsyncpa [#allocation3], 1 }
 0x370   :  { %472 = vsyncpa [#allocation3 + $0x1], 1 }
 0x371   :  { %473 = vsyncpa [#allocation6], 1 }
 0x372   :  { %474 = vsyncpa [#allocation4], 1 }
 0x373   :  { %476 = vsyncpa [#allocation4 + $0x1], 1 }

// kernel: tpu_custom_call.1
= control target key start
LH: loop header
LB: loop body
LE: loop exit
PB: predicated region body
PF: predicated region fallthrough
CT: control target
= control target key end

     0   :  { %9 = vsyncpa [#allocation3], 0  ;;  %s1140_s0 = inlined_call_operand.hbm [shape: f32[16,128], index: 0, kind: input, shape index: {}]   ;;  %s1141_s1 = inlined_call_operand.hbm [shape: f32[128,128], index: 1, kind: input, shape index: {}]   ;;  %s1142_s2 = inlined_call_operand.vmem [shape: f32[1,128], index: 2, kind: input, shape index: {}]   ;;  %s1143_s3 = inlined_call_operand.hbm [shape: f32[128,128], index: 3, kind: input, shape index: {}]   ;;  %s1144_s4 = inlined_call_operand.hbm [shape: f32[16,128], index: 4, kind: output, shape index: {}]  }
   0x1   :  { %11 = vsyncpa [#allocation3 + $0x1], 0 }
   0x2   :  { %12 = vsyncpa [#allocation6], 0 }
   0x3   :  { %13 = vsyncpa [#allocation4], 0 }
   0x4   :  { %15 = vsyncpa [#allocation4 + $0x1], 0  ;;  %s920_s15 = smov 0   ;;  %s922_s16 = smov 0  }
   0x5   :  { %s924_s17 = smov 0   ;;  %s926_s18 = smov 0  }
   0x6 LB: > { %s941_s19 = sadd.s32 4294967295, %s885_s18   ;;  %s541_s20 = sadd.s32 4294967294, %s885_s18   ;;  %s885_s18 = sphi %s926_s18, %s1166_s18   ;;  %s881_s17 = sphi %s924_s17, %s1165_s17   ;;  %s877_s16 = sphi %s922_s16, %s1164_s16   ;;  %s873_s15 = sphi %s920_s15, %s1163_s15  }
   0x7   : > { %p41_p0 = scmp.ne.s32.totalorder %s877_s16, %s873_s15  ;;  %p1145_p1 = scmp.eq.s32.totalorder %s941_s19, 0 }
   0x8   : > { %p134_p3 = scmp.eq.s32.totalorder %s541_s20, 1  ;;  %p542_p5 = scmp.ge.s32.totalorder %s885_s18, 1 }
   0x9   : > { %p950_p4 = por %p1145_p1, %p41_p0  ;;  %p141_p7 = scmp.lt.s32.totalorder %s885_s18, 3 }
   0xa   : > { %p955_p6 = por %p134_p3, %p41_p0  ;;  %s887_s24 = smov [#allocation5]  }
   0xb   : > { %s1149_s21 = scalar_select %p950_p4, 1, 0 }
   0xc   : > { %s1150_s22 = scalar_select %p955_p6, 1, 0 }
   0xd   : > { %p960_p8 = pnand %p542_p5, %p141_p7  ;;  %s153_s25 = sshll.u32 %s887_s24, 4  ;;  %s154_s25 = int_to_ptr.vmem [resolvable:$true] %s153_s25 }
   0xe   : > { %s888_s27 = smov [#allocation7]   ;;  %s748_s29 = scalar_lea.vmem %s154_s25, 2048 }
   0xf   : > { %s1151_s23 = scalar_select %p960_p8, 1, 0 }
  0x10   : > { %p674_p9 = pneg %p960_p8  ;;  %s169_s28 = sshll.u32 %s888_s27, 4  ;;  %s170_s28 = int_to_ptr.vmem [resolvable:$true] %s169_s28 }
  0x11   : > { %p749_p13 = scmp.ne.s32.totalorder %s154_s25, %s748_s29  ;;  %p756_p5 = scmp.lt.s32.totalorder %s154_s25, %s154_s25 }
  0x12   : > { %p969_p11 = pnand %p674_p9, %p1145_p1  ;;  %p757_p7 = scmp.lt.s32.totalorder %s748_s29, %s748_s29 }
  0x14   : > { %p739_p12 = pneg %p969_p11  ;;  %p758_p10 = por %p757_p7, %p756_p5 }
  0x16   : > { %p751_p0 = pnand %p749_p13, %p739_p12 }
  0x18   : > { %p752_p3 = pneg %p751_p0 }
  0x1a   : > { %p759_p9 = pnand %p758_p10, %p752_p3 }
  0x1c   : > { %762 = shalt.err (!%p759_p9)
}
  0x1d   : > { %s889_s30 = smov 128   ;;  %s890_s5 = smov 8  }
  0x1e   : > { %677 = dma.hbm_to_vmem [thread:$0]  (!%p969_p11), %s1141_s1, 2048, %s154_s25, [#allocation6], %s889_s30, %s889_s30, %s890_s5  }
  0x1f   : > { %s774_s8 = scalar_lea.vmem %s170_s28, 2048  ;;  %p782_p2 = scmp.lt.s32.totalorder %s170_s28, %s170_s28 }
  0x20   : > { %p775_p1 = scmp.ne.s32.totalorder %s170_s28, %s774_s8  ;;  %p783_p6 = scmp.lt.s32.totalorder %s774_s8, %s774_s8 }
  0x22   : > { %p777_p13 = pnand %p775_p1, %p739_p12  ;;  %p784_p5 = por %p783_p6, %p782_p2 }
  0x24   : > { %p778_p0 = pneg %p777_p13 }
  0x26   : > { %p785_p10 = pnand %p784_p5, %p778_p0 }
  0x28   : > { %788 = shalt.err (!%p785_p10)
}
  0x29   : > { %680 = dma.hbm_to_vmem [thread:$0]  (!%p969_p11), %s1143_s3, 2048, %s170_s28, [#allocation6], %s889_s30, %s889_s30, %s890_s5  }
  0x2a   : > { %s992_s11 = sadd.s32 1, %s885_s18   ;;  %s28_s12 = sadd.s32 1, %s881_s17 }
  0x2b   : > { %s25_s13 = ssub.s32 %s885_s18, %s992_s11  ;;  %p35_p1 = scmp.ne.s32.totalorder %s881_s17, %s877_s16 }
  0x2c   : > { %p26_p2 = scmp.eq.s32.totalorder %s25_s13, 0  ;;  %p36_p6 = scmp.eq.s32.totalorder %s885_s18, 0 }
  0x2d   : > { %p1153_p12 = scmp.eq.s32.totalorder %s941_s19, 1  ;;  %p691_p7 = scmp.lt.s32.totalorder %s885_s18, 2 }
  0x2e   : > { %s1008_s20 = scalar_select %p26_p2, %s881_s17, %s28_s12  }
  0x2f   : > { %p1002_p3 = por %p1153_p12, %p35_p1  ;;  %p37_p9 = por %p36_p6, %p35_p1 }
  0x30   : > { %s183_s24 = sand.u32 1, %s881_s17   ;;  %s547_s26 = sshll.u32 %s885_s18, 7 }
  0x31   : > { %s1154_s14 = scalar_select %p1002_p3, 1, 0 }
  0x32   : > { %s546_s25 = sshll.u32 %s183_s24, 3  ;;  %s1015_s29 = scalar_lea.hbm %s1140_s0, %s547_s26 }
  0x33   : > { %s187_s30 = scalar_lea.vmem [#allocation2], %s546_s25  ;;  %p1017_p11 = pnand %p691_p7, %p37_p9 }
  0x34   : > { %s194_s5 = sshll.u32 %s187_s30, 4  ;;  %s184_s7 = scalar_lea.sflag [#allocation3], %s183_s24  ;;  %s195_s5 = int_to_ptr.vmem [resolvable:$true] %s194_s5 }
  0x35   : > { %s789_s8 = scalar_lea.hbm %s1015_s29, 128  ;;  %p791_p0 = pneg %p1017_p11 }
  0x36   : > { %p790_p13 = scmp.ne.s32.totalorder %s1015_s29, %s789_s8  ;;  %s794_s12 = scalar_lea.hbm %s1140_s0, 256 }
  0x37   : > { %p795_p1 = scmp.lt.s32.totalorder %s1015_s29, %s1140_s0  ;;  %p796_p2 = scmp.lt.s32.totalorder %s794_s12, %s789_s8 }
  0x38   : > { %p792_p5 = pnand %p791_p0, %p790_p13 }
  0x39   : > { %p797_p6 = por %p796_p2, %p795_p1 }
  0x3a   : > { %p793_p10 = pneg %p792_p5 }
  0x3c   : > { %p798_p12 = pnand %p797_p6, %p793_p10 }
  0x3e   : > { %801 = shalt.err (!%p798_p12)
}
  0x3f   : > { %s802_s26 = scalar_lea.vmem %s195_s5, 128  ;;  %s891_s24 = smov [#allocation2]  }
  0x40   : > { %p803_p7 = scmp.ne.s32.totalorder %s195_s5, %s802_s26  ;;  %s807_s27 = sshll.u32 %s891_s24, 4  ;;  %s808_s27 = int_to_ptr.vmem [resolvable:$false] %s807_s27 }
  0x41   : > { %s809_s28 = scalar_lea.vmem %s808_s27, 256  ;;  %p810_p13 = scmp.lt.s32.totalorder %s195_s5, %s808_s27 }
  0x42   : > { %p805_p9 = pnand %p803_p7, %p791_p0  ;;  %p811_p5 = scmp.lt.s32.totalorder %s809_s28, %s802_s26 }
  0x44   : > { %p806_p3 = pneg %p805_p9  ;;  %p812_p4 = por %p811_p5, %p810_p13 }
  0x46   : > { %p813_p8 = pnand %p812_p4, %p806_p3 }
  0x48   : > { %816 = shalt.err (!%p813_p8)
}
  0x49   : > { %684 = dma.hbm_to_vmem [thread:$0]  (!%p1017_p11), %s1015_s29, 128, %s195_s5, %s184_s7  }
  0x4a   : > { %p1156_p10 = scmp.ne.s32.totalorder %s1151_s23, 0 }
  0x4b   : > { %s1038_s30 = sand.u32 (!%p1156_p10), 1, %s877_s16   ;;  %p1157_p4 = scmp.ne.s32.totalorder (!%p1156_p10), %s1149_s21, 0 }
  0x4c   : > { %203 = sbr.rel (%p1156_p10) target bundleno = 864 (0x360), region = 36  ;;  %s549_s8 = sshll.u32 (!%p1156_p10), %s1038_s30, 3 }
  0x4d   : > { %s206_s9 = scalar_lea.sflag (!%p1156_p10), [#allocation3], %s1038_s30  ;;  %s1044_s10 = scalar_lea.vmem (!%p1156_p10), [#allocation2], %s549_s8 }
  0x51   : > { %860 = dma.done.wait (%p1157_p4), %s206_s9, 128  }
  0x52   : > { %862 = vsyncadd (%p1157_p4), %s206_s9, 4294967168  ;;  %p1158_p8 = scmp.eq.s32.totalorder %s941_s19, 0 }
  0x54   : > { %864 = dma.done.wait (%p1158_p8), [#allocation6], 4096   ;;  %p1159_p3 = pmov %p1158_p8 }
  0x55   : > { %v892_v0 = vmov 0.0   ;;  %vm893_vm0 = vmmov 0   ;;  %v258_v1 = vld [vmem:[#allocation5 + $0x78] sm:$0xff]  ;;  %v257_v2 = vld [vmem:[#allocation5 + $0x70] sm:$0xff]  ;;  %v256_v3 = vld [vmem:[#allocation5 + $0x68] sm:$0xff]  ;;  %v361_v45 = vlaneseq  ;;  %s555_s29 = sshll.u32 %s941_s19, 7 }
  0x56   : > { %866 = vsyncadd (%p1159_p3), [#allocation6], 4294963200  ;;  %592 = vmatprep.subr.mxu0 %v892_v0  ;;  %624 = vmatprep.mubr.msk.f32.mxu0 %vm893_vm0, %v892_v0  ;;  %v255_v4 = vld [vmem:[#allocation5 + $0x60] sm:$0xff]  ;;  %v254_v5 = vld [vmem:[#allocation5 + $0x58] sm:$0xff]  ;;  %s241_s5 = scalar_lea.vmem [#allocation8], %s549_s8  ;;  %s1103_s13 = scalar_lea.hbm %s1144_s4, %s555_s29 }
  0x57   : > { %627 = vmatprep.subr.mxu1 %v892_v0  ;;  %659 = vmatprep.mubr.msk.f32.mxu1 %vm893_vm0, %v892_v0  ;;  %v253_v6 = vld [vmem:[#allocation5 + $0x50] sm:$0xff]  ;;  %v252_v7 = vld [vmem:[#allocation5 + $0x48] sm:$0xff]  ;;  %v251_v8 = vld [vmem:[#allocation5 + $0x40] sm:$0xff]  ;;  %v362_v46 = vand.u32 127, %v361_v45  ;;  %s452_s6 = sshll.u32 %s241_s5, 4  ;;  %s439_s25 = scalar_lea.sflag [#allocation4], %s1038_s30  ;;  %s453_s6 = int_to_ptr.vmem [resolvable:$true] %s452_s6 }
  0x58   : > { %593 = vmatpush3.xpose.msra.mxu0 %v258_v1  ;;  %v250_v9 = vld [vmem:[#allocation5 + $0x38] sm:$0xff]  ;;  %v249_v10 = vld [vmem:[#allocation5 + $0x30] sm:$0xff]  ;;  %v248_v11 = vld [vmem:[#allocation5 + $0x28] sm:$0xff]  ;;  %s817_s26 = scalar_lea.vmem %s453_s6, 128  ;;  %p1160_p0 = scmp.ne.s32.totalorder %s1154_s14, 0 }
  0x59   : > { %594 = vmatprep.subr.mxu0 %v892_v0  ;;  %v247_v12 = vld [vmem:[#allocation5 + $0x20] sm:$0xff]  ;;  %v246_v13 = vld [vmem:[#allocation5 + $0x18] sm:$0xff]  ;;  %v245_v14 = vld [vmem:[#allocation5 + $0x10] sm:$0xff]  ;;  %vm363_vm1 = vcmp.ge.s32.totalorder %v362_v46, 48  ;;  %vm364_vm2 = vcmp.lt.s32.totalorder %v362_v46, 64  ;;  %p818_p11 = scmp.ne.s32.totalorder %s453_s6, %s817_s26  ;;  %s894_s19 = smov [#allocation8]  }
  0x5a   : > { %v244_v15 = vld [vmem:[#allocation5 + $0x8] sm:$0xff]  ;;  %v243_v16 = vld [vmem:[#allocation5] sm:$0xff]  ;;  %v242_v17 = vld [vmem:[%s1044_s10] sm:$0xff]  ;;  %s821_s24 = sshll.u32 %s894_s19, 4  ;;  %s822_s24 = int_to_ptr.vmem [resolvable:$false] %s821_s24 }
  0x5b   : > { %v553_v18 = vld [vmem:[%s1142_s2] ss:$0 sm:$0xff]  ;;  %v360_v22 = vld [vmem:[#allocation7 + $0x78] sm:$0xff]  ;;  %v358_v24 = vld [vmem:[#allocation7 + $0x68] sm:$0xff]  ;;  %p819_p1 = pnand %p818_p11, %p1160_p0  ;;  %s823_s27 = scalar_lea.vmem %s822_s24, 256 }
  0x5c   : > { %595 = vmatpush3.xpose.msra.mxu0 %v257_v2  ;;  %628 = vmatpush3.xpose.msra.mxu1 %v360_v22  ;;  %v359_v23 = vld [vmem:[#allocation7 + $0x70] sm:$0xff]  ;;  %v357_v25 = vld [vmem:[#allocation7 + $0x60] sm:$0xff]  ;;  %v356_v26 = vld [vmem:[#allocation7 + $0x58] sm:$0xff]  ;;  %p824_p6 = scmp.lt.s32.totalorder %s453_s6, %s822_s24  ;;  %p825_p12 = scmp.lt.s32.totalorder %s823_s27, %s817_s26 }
  0x5d   : > { %596 = vmatprep.subr.mxu0 %v892_v0  ;;  %629 = vmatprep.subr.mxu1 %v892_v0  ;;  %v355_v27 = vld [vmem:[#allocation7 + $0x50] sm:$0xff]  ;;  %v354_v28 = vld [vmem:[#allocation7 + $0x48] sm:$0xff]  ;;  %v353_v29 = vld [vmem:[#allocation7 + $0x40] sm:$0xff]  ;;  %p820_p2 = pneg %p819_p1 }
  0x5e   : > { %v352_v30 = vld [vmem:[#allocation7 + $0x38] sm:$0xff]  ;;  %v351_v31 = vld [vmem:[#allocation7 + $0x30] sm:$0xff]  ;;  %v350_v32 = vld [vmem:[#allocation7 + $0x28] sm:$0xff]  ;;  %p826_p7 = por %p825_p12, %p824_p6 }
  0x5f   : > { %v349_v33 = vld [vmem:[#allocation7 + $0x20] sm:$0xff]  ;;  %v348_v38 = vld [vmem:[#allocation7 + $0x18] sm:$0xff]  ;;  %v347_v39 = vld [vmem:[#allocation7 + $0x10] sm:$0xff] }
  0x60   : > { %597 = vmatpush3.xpose.msra.mxu0 %v256_v3  ;;  %630 = vmatpush3.xpose.msra.mxu1 %v359_v23  ;;  %v346_v40 = vld [vmem:[#allocation7 + $0x8] sm:$0xff]  ;;  %v345_v41 = vld [vmem:[#allocation7] sm:$0xff]  ;;  %vm365_vm3 = vmand %vm363_vm1, %vm364_vm2  ;;  %p827_p9 = pnand %p826_p7, %p820_p2 }
  0x61   : > { %598 = vmatprep.subr.mxu0 %v892_v0  ;;  %631 = vmatprep.subr.mxu1 %v892_v0 }
  0x64   : > { %599 = vmatpush3.xpose.msra.mxu0 %v255_v4  ;;  %632 = vmatpush3.xpose.msra.mxu1 %v358_v24 }
  0x65   : > { %600 = vmatprep.subr.mxu0 %v892_v0  ;;  %633 = vmatprep.subr.mxu1 %v892_v0 }
  0x68   : > { %601 = vmatpush3.xpose.msra.mxu0 %v254_v5  ;;  %634 = vmatpush3.xpose.msra.mxu1 %v357_v25 }
  0x69   : > { %602 = vmatprep.subr.mxu0 %v892_v0  ;;  %635 = vmatprep.subr.mxu1 %v892_v0 }
  0x6c   : > { %603 = vmatpush3.xpose.msra.mxu0 %v253_v6  ;;  %636 = vmatpush3.xpose.msra.mxu1 %v356_v26 }
  0x6d   : > { %604 = vmatprep.subr.mxu0 %v892_v0  ;;  %637 = vmatprep.subr.mxu1 %v892_v0 }
  0x70   : > { %605 = vmatpush3.xpose.msra.mxu0 %v252_v7  ;;  %638 = vmatpush3.xpose.msra.mxu1 %v355_v27 }
  0x71   : > { %606 = vmatprep.subr.mxu0 %v892_v0  ;;  %639 = vmatprep.subr.mxu1 %v892_v0 }
  0x74   : > { %607 = vmatpush3.xpose.msra.mxu0 %v251_v8  ;;  %640 = vmatpush3.xpose.msra.mxu1 %v354_v28 }
  0x75   : > { %608 = vmatprep.subr.mxu0 %v892_v0  ;;  %641 = vmatprep.subr.mxu1 %v892_v0 }
  0x78   : > { %609 = vmatpush3.xpose.msra.mxu0 %v250_v9  ;;  %642 = vmatpush3.xpose.msra.mxu1 %v353_v29 }
  0x79   : > { %610 = vmatprep.subr.mxu0 %v892_v0  ;;  %643 = vmatprep.subr.mxu1 %v892_v0 }
  0x7c   : > { %611 = vmatpush3.xpose.msra.mxu0 %v249_v10  ;;  %644 = vmatpush3.xpose.msra.mxu1 %v352_v30 }
  0x7d   : > { %612 = vmatprep.subr.mxu0 %v892_v0  ;;  %645 = vmatprep.subr.mxu1 %v892_v0 }
  0x80   : > { %613 = vmatpush3.xpose.msra.mxu0 %v248_v11  ;;  %646 = vmatpush3.xpose.msra.mxu1 %v351_v31 }
  0x81   : > { %614 = vmatprep.subr.mxu0 %v892_v0  ;;  %647 = vmatprep.subr.mxu1 %v892_v0 }
  0x84   : > { %615 = vmatpush3.xpose.msra.mxu0 %v247_v12  ;;  %648 = vmatpush3.xpose.msra.mxu1 %v350_v32 }
  0x85   : > { %616 = vmatprep.subr.mxu0 %v892_v0  ;;  %649 = vmatprep.subr.mxu1 %v892_v0 }
  0x88   : > { %617 = vmatpush3.xpose.msra.mxu0 %v246_v13  ;;  %650 = vmatpush3.xpose.msra.mxu1 %v349_v33 }
  0x89   : > { %618 = vmatprep.subr.mxu0 %v892_v0  ;;  %651 = vmatprep.subr.mxu1 %v892_v0 }
  0x8c   : > { %619 = vmatpush3.xpose.msra.mxu0 %v245_v14  ;;  %652 = vmatpush3.xpose.msra.mxu1 %v348_v38 }
  0x8d   : > { %620 = vmatprep.subr.mxu0 %v892_v0  ;;  %653 = vmatprep.subr.mxu1 %v892_v0 }
  0x90   : > { %621 = vmatpush3.xpose.msra.mxu0 %v244_v15  ;;  %654 = vmatpush3.xpose.msra.mxu1 %v347_v39 }
  0x91   : > { %622 = vmatprep.subr.mxu0 %v892_v0  ;;  %655 = vmatprep.subr.mxu1 %v892_v0 }
  0x94   : > { %623 = vmatpush3.xpose.msra.mxu0 %v243_v16  ;;  %656 = vmatpush3.xpose.msra.mxu1 %v346_v40 }
  0x95   : > { %657 = vmatprep.subr.mxu1 %v892_v0 }
  0x97   : > { %625 = vmatmul.mubr.f32.vlgmr.msra.gmra.mxu0 %v242_v17 }
  0x98   : > { %658 = vmatpush3.xpose.msra.mxu1 %v345_v41 }
 0x157   : > { %v332_v19 = vpop.f32.mrf.mxu0 }
 0x158   : > { %v1077_v20 = vadd.f32 %v553_v18, %v332_v19 }
 0x159   : > { %v626_v21 = vpop.f32.mrf.mxu0 }
 0x15a   : > { %336 = vmax.xlane.f32.xlu0 %v1077_v20  ;;  %v366_v47 = vsel %vm365_vm3, %v1077_v20, 0.0 }
 0x1e3   : > { %v337_v34 = vpop.xlane.xlu0 %336 }
 0x1e4   : > { %v338_v35 = vsub.f32 %v1077_v20, %v337_v34 }
 0x1e6   : > { %v339_v36 = vmul.f32 1.442695, %v338_v35 }
 0x1e8   : > { %733 = vpow2.f32 %v339_v36 }
 0x1f5   : > { %v734_v37 = vpop.eup %733 }
 0x1f6   : > { %341 = vadd.xlane.f32.xlu0 %v734_v37 }
 0x27f   : > { %v342_v42 = vpop.xlane.xlu0 %341 }
 0x280   : > { %735 = vrcp.f32 %v342_v42 }
 0x28d   : > { %v736_v43 = vpop.eup %735 }
 0x28e   : > { %v344_v44 = vmul.f32 %v736_v43, %v734_v37 }
 0x290   : > { %660 = vmatmul.mubr.f32.vlgmr.msra.gmra.mxu1 %v344_v44 }
 0x350   : > { %v433_v48 = vpop.f32.mrf.mxu1 }
 0x351   : > { %v434_v49 = vadd.f32 %v433_v48, %v366_v47 }
 0x352   : > { %v661_v50 = vpop.f32.mrf.mxu1 }
 0x353   : > { %437 = vst [vmem:[%s241_s5] sm:$0xff] %v434_v49 }
 0x354   : > { %830 = shalt.err (!%p827_p9)
}
 0x355   : > { %s831_s28 = scalar_lea.hbm %s1103_s13, 128  ;;  %s835_s9 = scalar_lea.hbm %s1144_s4, 256 }
 0x356   : > { %p832_p13 = scmp.ne.s32.totalorder %s1103_s13, %s831_s28  ;;  %p836_p4 = scmp.lt.s32.totalorder %s1103_s13, %s1144_s4 }
 0x357   : > { %p837_p8 = scmp.lt.s32.totalorder %s835_s9, %s831_s28 }
 0x358   : > { %p833_p5 = pnand %p832_p13, %p1160_p0 }
 0x359   : > { %p838_p3 = por %p837_p8, %p836_p4 }
 0x35a   : > { %p834_p10 = pneg %p833_p5 }
 0x35c   : > { %p839_p11 = pnand %p838_p3, %p834_p10 }
 0x35e   : > { %842 = shalt.err (!%p839_p11)
}
 0x35f   : > { %672 = dma.vmem_to_hbm [thread:$0]  (%p1160_p0), %s453_s6, 128, %s1103_s13, %s439_s25  }
 0x360 PF: > { %s464_s23 = sand.u32 1, %s873_s15   ;;  %p1161_p1 = scmp.ne.s32.totalorder %s1150_s22, 0 }
 0x361   : > { %p1162_p2 = scmp.ge.s32.totalorder %s885_s18, 2  ;;  %s465_s29 = scalar_lea.sflag [#allocation4], %s464_s23 }
 0x363   : > { %p686_p6 = pnand %p1162_p2, %p1161_p1 }
 0x365   : > { %p687_p12 = pneg %p686_p6 }
 0x367   : > { %868 = dma.done.wait (%p687_p12), %s465_s29, 128  }
 0x368   : > { %870 = vsyncadd (%p687_p12), %s465_s29, 4294967168  ;;  %p18_p7 = scmp.ge.s32.totalorder %s992_s11, 4   ;;  %s1163_s15 = smov %s877_s16 }
 0x369   : > { %s1164_s16 = smov %s881_s17  ;;  %s1165_s17 = smov %s1008_s20 }
 0x36a   : > { %s1166_s18 = smov %s992_s11  ;;  %20 = sbr.rel (!%p18_p7) target bundleno = 6 (0x6), region = 89 }
 0x36f   :  { %470 = vsyncpa [#allocation3], 1 }
 0x370   :  { %472 = vsyncpa [#allocation3 + $0x1], 1 }
 0x371   :  { %473 = vsyncpa [#allocation6], 1 }
 0x372   :  { %474 = vsyncpa [#allocation4], 1 }
 0x373   :  { %476 = vsyncpa [#allocation4 + $0x1], 1 }

</bundles_post_ra>
